<compile_context>
chip_gen: v5e
topology: v5e:2x2
jax: 0.10.0
libtpu: 0.0.40
codegen_flags: <defaults>
</compile_context>

<pallas_src>
import math

import jax
import jax.numpy as jnp
from jax.experimental import pallas as pl
from jax.experimental.pallas import tpu as pltpu


def _round_up(n, m):
    return ((n + m - 1) // m) * m


def _make_kernel(obs_dim, num_layers, slab_w, bias_rows, dims_list, accel_div, out_w):
    """MLP (Linear+Tanh)*N + Linear from a single packed parameter slab, then a
    full-width masked per-group argmax and one lane-dense store."""
    num_splits = len(dims_list)
    num_hidden = num_layers - 1
    # Per-group scalar scale/offset -> inline scalar literals, NOT array consts.
    scales = [1.0 / accel_div if i == 0 else 1.0 for i in range(num_splits)]
    offsets = [-1.0 if i == 1 else 0.0 for i in range(num_splits)]

    def kernel(x_ref, slab_ref, out_ref):
        # ---- unpack the packed parameter slab (static, aligned views) ----
        bias_blk = slab_ref[0:bias_rows, :]                       # [bias_rows, slab_w]

        # ---- MLP: x @ W + b, tanh on hidden layers ----
        h = x_ref[...]                                            # [1, obs_dim]
        for l in range(num_layers):
            r0 = bias_rows + l * slab_w
            k = obs_dim if l == 0 else slab_w                     # layer-0 uses only
            w = slab_ref[r0:r0 + k, :]                            # the real obs rows
            b = bias_blk[l:l + 1, :]                              # [1, slab_w]
            z = jnp.dot(h, w, preferred_element_type=jnp.float32) + b
            h = jnp.tanh(z) if l < num_hidden else z
        logits = h                                                # [1, slab_w]

        # ---- per-group argmax on raw logits, full-width lane masks ----
        lane = jax.lax.broadcasted_iota(jnp.int32, (1, slab_w), 1)
        out_lane = jax.lax.broadcasted_iota(jnp.int32, (1, out_w), 1)
        res = jnp.zeros((1, out_w), jnp.float32)
        off = 0
        for s_idx, d in enumerate(dims_list):
            in_grp = (lane >= off) & (lane < off + d)
            masked = jnp.where(in_grp, logits, -jnp.inf)
            m = jnp.max(masked, axis=-1, keepdims=True)           # [1, 1]
            cand = jnp.where(in_grp & (masked >= m), lane - off, slab_w)
            arg = jnp.min(cand, axis=-1, keepdims=True).astype(jnp.float32)
            val = arg * scales[s_idx] + offsets[s_idx]            # scalar fold
            res = jnp.where(out_lane == s_idx, val, res)
            off += d

        out_ref[...] = res                                        # one lane-dense store

    return kernel


class IceHockeyModelPallas:
    """JAX/Pallas re-implementation of IceHockeyModel (inference forward only,
    use_batch_norm=False path)."""

    def __init__(self, observation_dim, action_logits_dim,
                 action_logits_dims_list, net_arch, accel_div=100, seed=0):
        assert sum(action_logits_dims_list) == action_logits_dim
        self.observation_dim = observation_dim
        self.action_logits_dim = action_logits_dim
        self.action_logits_dims_list = list(action_logits_dims_list)
        self.net_arch = list(net_arch)
        self.accel_div = float(accel_div)
        self.num_splits = len(self.action_logits_dims_list)

        dims = [observation_dim] + self.net_arch + [action_logits_dim]
        num_layers = len(dims) - 1
        slab_w = max(_round_up(d, 128) for d in dims)   # uniform lane-dense width
        bias_rows = _round_up(num_layers, 8)            # sublane-aligned bias block
        slab_rows = bias_rows + num_layers * slab_w
        out_w = 128                                     # lane-dense output width

        # ---- parameters (PyTorch-Linear-style uniform init) + packed slab ----
        key = jax.random.PRNGKey(seed)
        self.params = []                                # real shapes (reference)
        slab = jnp.zeros((slab_rows, slab_w), jnp.float32)
        for l in range(num_layers):
            fan_in, fan_out = dims[l], dims[l + 1]
            key, kw, kb = jax.random.split(key, 3)
            bound = 1.0 / math.sqrt(fan_in)
            w = jax.random.uniform(kw, (fan_in, fan_out), jnp.float32, -bound, bound)
            b = jax.random.uniform(kb, (fan_out,), jnp.float32, -bound, bound)
            self.params += [w, b]
            r0 = bias_rows + l * slab_w
            slab = slab.at[r0:r0 + fan_in, :fan_out].set(w)   # W_l (x @ W layout)
            slab = slab.at[l, :fan_out].set(b)                # bias row l
        self.param_slab = slab   # zero padding is inert: tanh(0)=0, zero rows/cols

        # ---- build kernel + pallas_call + jit ONCE ----
        kernel = _make_kernel(observation_dim, num_layers, slab_w, bias_rows,
                              self.action_logits_dims_list, self.accel_div, out_w)
        pallas_fn = pl.pallas_call(
            kernel,
            out_shape=jax.ShapeDtypeStruct((1, out_w), jnp.float32),
            # Tiny shapes: whole arrays resident in VMEM, single invocation,
            # 2 input DMAs total (obs + packed param slab).
            in_specs=[pl.BlockSpec(memory_space=pltpu.MemorySpace.VMEM),
                      pl.BlockSpec(memory_space=pltpu.MemorySpace.VMEM)],
            out_specs=pl.BlockSpec(memory_space=pltpu.MemorySpace.VMEM),
        )

        obs_dim = observation_dim
        num_splits = self.num_splits

        def _forward(observation, param_slab):
            x = jnp.asarray(observation, jnp.float32).reshape(1, obs_dim)
            return pallas_fn(x, param_slab)[0, :num_splits]      # -> (num_splits,)

        self._forward = jax.jit(_forward)

    def __call__(self, observation):
        # Returns a single (num_splits,) float32 device array:
        #   [argmax(group0)/accel_div, argmax(group1)-1, argmax(group2), ...]
        return self._forward(observation, self.param_slab)


def _reference_forward(model, observation):
    """Pure-JAX reference mirroring the PyTorch forward semantics."""
    x = jnp.asarray(observation, jnp.float32).reshape(1, -1)
    p = model.params
    n_hidden = len(model.net_arch)
    h = x
    for l in range(n_hidden):
        h = jnp.tanh(h @ p[2 * l] + p[2 * l + 1])
    logits = (h @ p[2 * n_hidden] + p[2 * n_hidden + 1])[0]
    res = []
    off = 0
    for d in model.action_logits_dims_list:
        split = logits[off:off + d]
        new_split = split - jax.scipy.special.logsumexp(split)
        probs = jax.nn.softmax(new_split)
        res.append(jnp.argmax(probs).astype(jnp.float32))
        off += d
    res[0] = res[0] / model.accel_div
    res[1] = res[1] - 1.0
    return jnp.stack(res)


if __name__ == "__main__":
    observation_dim = 16
    net_arch = [32, 32]
    action_logits_dims_list = [5, 3, 2]   # e.g. accel bins, steer bins, brake bins
    action_logits_dim = sum(action_logits_dims_list)

    model = IceHockeyModelPallas(
        observation_dim=observation_dim,
        action_logits_dim=action_logits_dim,
        action_logits_dims_list=action_logits_dims_list,
        net_arch=net_arch,
        accel_div=100,
        seed=0,
    )

    obs = jax.random.normal(jax.random.PRNGKey(0), (observation_dim,), jnp.float32)

    out = jax.block_until_ready(model(obs))           # (3,) device array
    out2 = jax.block_until_ready(model(obs))          # jit-cache hit, no retrace

    ref = jax.block_until_ready(_reference_forward(model, obs))
    for o, r in zip(out, ref):
        assert abs(float(o) - float(r)) < 1e-5, (float(o), float(r))
    for o, r in zip(out2, ref):
        assert abs(float(o) - float(r)) < 1e-5, (float(o), float(r))

    print("KERNEL_OK")
</pallas_src>

<mosaic_0001>
module attributes {stable_mosaic.version = 11 : i64} {
  func.func @kernel(%arg0: memref<1x16xf32, #tpu.memory_space<vmem>>, %arg1: memref<392x128xf32, #tpu.memory_space<vmem>>, %arg2: memref<1x128xf32, #tpu.memory_space<vmem>>) attributes {dimension_semantics = [], scalar_prefetch = 0 : i64, scratch_operands = 0 : i64, tpu.core_type = #tpu.core_type<tc>} {
    %c0 = arith.constant 0 : index
    %c0_0 = arith.constant 0 : index
    %0 = vector.load %arg1[%c0, %c0_0] : memref<392x128xf32, #tpu.memory_space<vmem>>, vector<8x128xf32>
    %c0_1 = arith.constant 0 : index
    %c0_2 = arith.constant 0 : index
    %1 = vector.load %arg0[%c0_1, %c0_2] : memref<1x16xf32, #tpu.memory_space<vmem>>, vector<1x16xf32>
    %c8 = arith.constant 8 : index
    %c0_3 = arith.constant 0 : index
    %2 = vector.load %arg1[%c8, %c0_3] : memref<392x128xf32, #tpu.memory_space<vmem>>, vector<16x128xf32>
    %3 = vector.extract_strided_slice %0 {offsets = [0, 0], sizes = [1, 128], strides = [1, 1]} : vector<8x128xf32> to vector<1x128xf32>
    %cst = arith.constant dense<0.000000e+00> : vector<1x128xf32>
    %4 = tpu.matmul %1, %2, %cst {dimension_numbers = #tpu.dot_dimension_numbers<[1], [0], [0], [1], [0, 0, 1, 1], [], []>} : vector<1x16xf32>, vector<16x128xf32>, vector<1x128xf32> -> vector<1x128xf32>
    %5 = arith.addf %4, %3 : vector<1x128xf32>
    %6 = math.tanh %5 : vector<1x128xf32>
    %c136 = arith.constant 136 : index
    %c0_4 = arith.constant 0 : index
    %7 = vector.load %arg1[%c136, %c0_4] : memref<392x128xf32, #tpu.memory_space<vmem>>, vector<128x128xf32>
    %8 = vector.extract_strided_slice %0 {offsets = [1, 0], sizes = [1, 128], strides = [1, 1]} : vector<8x128xf32> to vector<1x128xf32>
    %cst_5 = arith.constant dense<0.000000e+00> : vector<1x128xf32>
    %9 = tpu.matmul %6, %7, %cst_5 {dimension_numbers = #tpu.dot_dimension_numbers<[1], [0], [0], [1], [0, 0, 1, 1], [], []>} : vector<1x128xf32>, vector<128x128xf32>, vector<1x128xf32> -> vector<1x128xf32>
    %10 = arith.addf %9, %8 : vector<1x128xf32>
    %11 = math.tanh %10 : vector<1x128xf32>
    %c264 = arith.constant 264 : index
    %c0_6 = arith.constant 0 : index
    %12 = vector.load %arg1[%c264, %c0_6] : memref<392x128xf32, #tpu.memory_space<vmem>>, vector<128x128xf32>
    %13 = vector.extract_strided_slice %0 {offsets = [2, 0], sizes = [1, 128], strides = [1, 1]} : vector<8x128xf32> to vector<1x128xf32>
    %cst_7 = arith.constant dense<0.000000e+00> : vector<1x128xf32>
    %14 = tpu.matmul %11, %12, %cst_7 {dimension_numbers = #tpu.dot_dimension_numbers<[1], [0], [0], [1], [0, 0, 1, 1], [], []>} : vector<1x128xf32>, vector<128x128xf32>, vector<1x128xf32> -> vector<1x128xf32>
    %15 = arith.addf %14, %13 : vector<1x128xf32>
    %16 = tpu.iota {dimensions = array<i32: 1>} : vector<1x128xi32>
    %17 = tpu.iota {dimensions = array<i32: 1>} : vector<1x128xi32>
    %cst_8 = arith.constant 0.000000e+00 : f32
    %18 = vector.broadcast %cst_8 : f32 to vector<1x128xf32>
    %c0_i32 = arith.constant 0 : i32
    %19 = vector.broadcast %c0_i32 : i32 to vector<1x128xi32>
    %20 = arith.cmpi sge, %16, %19 : vector<1x128xi32>
    %c5_i32 = arith.constant 5 : i32
    %21 = vector.broadcast %c5_i32 : i32 to vector<1x128xi32>
    %22 = arith.cmpi slt, %16, %21 : vector<1x128xi32>
    %23 = arith.andi %20, %22 : vector<1x128xi1>
    %cst_9 = arith.constant 0xFF800000 : f32
    %24 = vector.broadcast %cst_9 : f32 to vector<1x128xf32>
    %25 = arith.select %23, %15, %24 : vector<1x128xi1>, vector<1x128xf32>
    %cst_10 = arith.constant dense<0xFF800000> : vector<1xf32>
    %26 = vector.multi_reduction <maximumf>, %25, %cst_10 [1] : vector<1x128xf32> to vector<1xf32>
    %27 = vector.shape_cast %26 : vector<1xf32> to vector<1x1xf32>
    %28 = vector.broadcast %27 : vector<1x1xf32> to vector<1x128xf32>
    %29 = arith.cmpf oge, %25, %28 : vector<1x128xf32>
    %30 = arith.andi %23, %29 : vector<1x128xi1>
    %c0_i32_11 = arith.constant 0 : i32
    %31 = vector.broadcast %c0_i32_11 : i32 to vector<1x128xi32>
    %32 = arith.subi %16, %31 : vector<1x128xi32>
    %c128_i32 = arith.constant 128 : i32
    %33 = vector.broadcast %c128_i32 : i32 to vector<1x128xi32>
    %34 = arith.select %30, %32, %33 : vector<1x128xi1>, vector<1x128xi32>
    %cst_12 = arith.constant dense<2147483647> : vector<1xi32>
    %35 = vector.multi_reduction <minsi>, %34, %cst_12 [1] : vector<1x128xi32> to vector<1xi32>
    %36 = vector.shape_cast %35 : vector<1xi32> to vector<1x1xi32>
    %37 = arith.sitofp %36 : vector<1x1xi32> to vector<1x1xf32>
    %cst_13 = arith.constant 0.00999999977 : f32
    %38 = vector.broadcast %cst_13 : f32 to vector<1x1xf32>
    %39 = arith.mulf %37, %38 : vector<1x1xf32>
    %cst_14 = arith.constant 0.000000e+00 : f32
    %40 = vector.broadcast %cst_14 : f32 to vector<1x1xf32>
    %41 = arith.addf %39, %40 : vector<1x1xf32>
    %c0_i32_15 = arith.constant 0 : i32
    %42 = vector.broadcast %c0_i32_15 : i32 to vector<1x128xi32>
    %43 = arith.cmpi eq, %17, %42 : vector<1x128xi32>
    %44 = vector.shape_cast %41 : vector<1x1xf32> to vector<1x1xf32>
    %45 = vector.broadcast %44 : vector<1x1xf32> to vector<1x128xf32>
    %46 = arith.select %43, %45, %18 : vector<1x128xi1>, vector<1x128xf32>
    %c5_i32_16 = arith.constant 5 : i32
    %47 = vector.broadcast %c5_i32_16 : i32 to vector<1x128xi32>
    %48 = arith.cmpi sge, %16, %47 : vector<1x128xi32>
    %c8_i32 = arith.constant 8 : i32
    %49 = vector.broadcast %c8_i32 : i32 to vector<1x128xi32>
    %50 = arith.cmpi slt, %16, %49 : vector<1x128xi32>
    %51 = arith.andi %48, %50 : vector<1x128xi1>
    %cst_17 = arith.constant 0xFF800000 : f32
    %52 = vector.broadcast %cst_17 : f32 to vector<1x128xf32>
    %53 = arith.select %51, %15, %52 : vector<1x128xi1>, vector<1x128xf32>
    %cst_18 = arith.constant dense<0xFF800000> : vector<1xf32>
    %54 = vector.multi_reduction <maximumf>, %53, %cst_18 [1] : vector<1x128xf32> to vector<1xf32>
    %55 = vector.shape_cast %54 : vector<1xf32> to vector<1x1xf32>
    %56 = vector.broadcast %55 : vector<1x1xf32> to vector<1x128xf32>
    %57 = arith.cmpf oge, %53, %56 : vector<1x128xf32>
    %58 = arith.andi %51, %57 : vector<1x128xi1>
    %c5_i32_19 = arith.constant 5 : i32
    %59 = vector.broadcast %c5_i32_19 : i32 to vector<1x128xi32>
    %60 = arith.subi %16, %59 : vector<1x128xi32>
    %c128_i32_20 = arith.constant 128 : i32
    %61 = vector.broadcast %c128_i32_20 : i32 to vector<1x128xi32>
    %62 = arith.select %58, %60, %61 : vector<1x128xi1>, vector<1x128xi32>
    %cst_21 = arith.constant dense<2147483647> : vector<1xi32>
    %63 = vector.multi_reduction <minsi>, %62, %cst_21 [1] : vector<1x128xi32> to vector<1xi32>
    %64 = vector.shape_cast %63 : vector<1xi32> to vector<1x1xi32>
    %65 = arith.sitofp %64 : vector<1x1xi32> to vector<1x1xf32>
    %cst_22 = arith.constant 1.000000e+00 : f32
    %66 = vector.broadcast %cst_22 : f32 to vector<1x1xf32>
    %67 = arith.mulf %65, %66 : vector<1x1xf32>
    %cst_23 = arith.constant -1.000000e+00 : f32
    %68 = vector.broadcast %cst_23 : f32 to vector<1x1xf32>
    %69 = arith.addf %67, %68 : vector<1x1xf32>
    %c1_i32 = arith.constant 1 : i32
    %70 = vector.broadcast %c1_i32 : i32 to vector<1x128xi32>
    %71 = arith.cmpi eq, %17, %70 : vector<1x128xi32>
    %72 = vector.shape_cast %69 : vector<1x1xf32> to vector<1x1xf32>
    %73 = vector.broadcast %72 : vector<1x1xf32> to vector<1x128xf32>
    %74 = arith.select %71, %73, %46 : vector<1x128xi1>, vector<1x128xf32>
    %c8_i32_24 = arith.constant 8 : i32
    %75 = vector.broadcast %c8_i32_24 : i32 to vector<1x128xi32>
    %76 = arith.cmpi sge, %16, %75 : vector<1x128xi32>
    %c10_i32 = arith.constant 10 : i32
    %77 = vector.broadcast %c10_i32 : i32 to vector<1x128xi32>
    %78 = arith.cmpi slt, %16, %77 : vector<1x128xi32>
    %79 = arith.andi %76, %78 : vector<1x128xi1>
    %cst_25 = arith.constant 0xFF800000 : f32
    %80 = vector.broadcast %cst_25 : f32 to vector<1x128xf32>
    %81 = arith.select %79, %15, %80 : vector<1x128xi1>, vector<1x128xf32>
    %cst_26 = arith.constant dense<0xFF800000> : vector<1xf32>
    %82 = vector.multi_reduction <maximumf>, %81, %cst_26 [1] : vector<1x128xf32> to vector<1xf32>
    %83 = vector.shape_cast %82 : vector<1xf32> to vector<1x1xf32>
    %84 = vector.broadcast %83 : vector<1x1xf32> to vector<1x128xf32>
    %85 = arith.cmpf oge, %81, %84 : vector<1x128xf32>
    %86 = arith.andi %79, %85 : vector<1x128xi1>
    %c8_i32_27 = arith.constant 8 : i32
    %87 = vector.broadcast %c8_i32_27 : i32 to vector<1x128xi32>
    %88 = arith.subi %16, %87 : vector<1x128xi32>
    %c128_i32_28 = arith.constant 128 : i32
    %89 = vector.broadcast %c128_i32_28 : i32 to vector<1x128xi32>
    %90 = arith.select %86, %88, %89 : vector<1x128xi1>, vector<1x128xi32>
    %cst_29 = arith.constant dense<2147483647> : vector<1xi32>
    %91 = vector.multi_reduction <minsi>, %90, %cst_29 [1] : vector<1x128xi32> to vector<1xi32>
    %92 = vector.shape_cast %91 : vector<1xi32> to vector<1x1xi32>
    %93 = arith.sitofp %92 : vector<1x1xi32> to vector<1x1xf32>
    %cst_30 = arith.constant 1.000000e+00 : f32
    %94 = vector.broadcast %cst_30 : f32 to vector<1x1xf32>
    %95 = arith.mulf %93, %94 : vector<1x1xf32>
    %cst_31 = arith.constant 0.000000e+00 : f32
    %96 = vector.broadcast %cst_31 : f32 to vector<1x1xf32>
    %97 = arith.addf %95, %96 : vector<1x1xf32>
    %c2_i32 = arith.constant 2 : i32
    %98 = vector.broadcast %c2_i32 : i32 to vector<1x128xi32>
    %99 = arith.cmpi eq, %17, %98 : vector<1x128xi32>
    %100 = vector.shape_cast %97 : vector<1x1xf32> to vector<1x1xf32>
    %101 = vector.broadcast %100 : vector<1x1xf32> to vector<1x128xf32>
    %102 = arith.select %99, %101, %74 : vector<1x128xi1>, vector<1x128xf32>
    %c0_32 = arith.constant 0 : index
    %c0_33 = arith.constant 0 : index
    %103 = vector.load %arg2[%c0_32, %c0_33] : memref<1x128xf32, #tpu.memory_space<vmem>>, vector<1x128xf32>
    tpu.vector_store %arg2[%c0_32, %c0_33], %102 {strides = array<i32>} : memref<1x128xf32, #tpu.memory_space<vmem>>, vector<1x128xf32>,
    return
  }
}

</mosaic_0001>

<bundles_post_ra>
// kernel: _forward.1
= control target key start
LH: loop header
LB: loop body
LE: loop exit
PB: predicated region body
PF: predicated region fallthrough
CT: control target
= control target key end

     0   :  { %7 = vsyncpa [#allocation3], 0  ;;  %s378_s0 = inlined_call_operand.hbm [shape: f32[1,16], index: 0, kind: input, shape index: {}]   ;;  %s379_s1 = inlined_call_operand.hbm [shape: f32[392,128], index: 1, kind: input, shape index: {}]   ;;  %s380_s2 = inlined_call_operand.vmem [shape: f32[1,128], index: 2, kind: output, shape index: {}]  }
   0x1   :  { %s14_s11 = sshll.u32 %s378_s0, 4  ;;  %s15_s11 = int_to_ptr.hbm [resolvable:$true] %s14_s11 }
   0x2   :  { %8 = vsyncpa [#allocation5], 0  ;;  %s311_s12 = smov [#allocation2]   ;;  %s24_s16 = sshll.u32 %s379_s1, 4  ;;  %s25_s16 = int_to_ptr.hbm [resolvable:$true] %s24_s16 }
   0x3   :  { %s16_s13 = sshll.u32 %s311_s12, 4  ;;  %s312_s17 = smov [#allocation4]   ;;  %s17_s13 = int_to_ptr.vmem [resolvable:$true] %s16_s13 }
   0x4   :  { %19 = dma.hbm_to_vmem [thread:$0]  %s15_s11, 16, %s17_s13, [#allocation3]  }
   0x5   :  { %s26_s18 = sshll.u32 %s312_s17, 4  ;;  %s313_s19 = smov 128   ;;  %s27_s18 = int_to_ptr.vmem [resolvable:$true] %s26_s18 }
   0x6   :  { %s314_s20 = smov 8  }
   0x7   :  { %32 = dma.hbm_to_vmem [thread:$0]  %s25_s16, 6272, %s27_s18, [#allocation5], %s313_s19, %s313_s19, %s314_s20  }
   0x8   :  { %307 = dma.done.wait [#allocation3], 16  }
   0x9   :  { %308 = vsyncadd [#allocation3], 4294967280 }
   0xa   :  { %309 = dma.done.wait [#allocation5], 6272  }
   0xb   :  { %310 = vsyncadd [#allocation5], 4294961024  ;;  %v44_v0 = vld [vmem:[#allocation4 + $0x10] sm:$0xff]  ;;  %v43_v1 = vld [vmem:[#allocation4 + $0x8] sm:$0xff]  ;;  %vm45_vm0 = vcmask 130048   ;;  %v148_v43 = vlaneseq  ;;  %vm154_vm5 = vcmask 1040384  }
   0xc   :  { %63 = vmatpush.msra.mxu0 %v44_v0  ;;  %v42_v2 = vld [vmem:[#allocation2] sm:$0x1]  ;;  %v85_v3 = vld [vmem:[#allocation4 + $0x100] sm:$0xff]  ;;  %v83_v5 = vld [vmem:[#allocation4 + $0xf0] sm:$0xff] }
   0xd   :  { %v84_v4 = vld [vmem:[#allocation4 + $0xf8] sm:$0xff]  ;;  %89 = vmatpush.msra.mxu1 %v85_v3  ;;  %v82_v6 = vld [vmem:[#allocation4 + $0xe8] sm:$0xff]  ;;  %v81_v7 = vld [vmem:[#allocation4 + $0xe0] sm:$0xff]  ;;  %v336_v44 = vand.u32 127, %v148_v43 }
   0xe   :  { %64 = vmatpush.msra.mxu0 %v43_v1  ;;  %v80_v8 = vld [vmem:[#allocation4 + $0xd8] sm:$0xff]  ;;  %v79_v9 = vld [vmem:[#allocation4 + $0xd0] sm:$0xff]  ;;  %v78_v10 = vld [vmem:[#allocation4 + $0xc8] sm:$0xff] }
   0xf   :  { %248 = vmatmul.msk.f32.vlgmr.msra.gmra.mxu0 %vm45_vm0, %v42_v2  ;;  %90 = vmatpush.msra.mxu1 %v84_v4  ;;  %v77_v11 = vld [vmem:[#allocation4 + $0xc0] sm:$0xff]  ;;  %v76_v12 = vld [vmem:[#allocation4 + $0xb8] sm:$0xff]  ;;  %v75_v13 = vld [vmem:[#allocation4 + $0xb0] sm:$0xff]  ;;  %vm211_vm1 = vcmp.ge.s32.totalorder %v336_v44, 8  ;;  %vm212_vm2 = vcmp.lt.s32.totalorder %v336_v44, 10  ;;  %vm151_vm4 = vcmp.lt.s32.totalorder %v336_v44, 5 }
  0x10   :  { %v74_v14 = vld [vmem:[#allocation4 + $0xa8] sm:$0xff]  ;;  %v73_v15 = vld [vmem:[#allocation4 + $0xa0] sm:$0xff]  ;;  %v72_v16 = vld [vmem:[#allocation4 + $0x98] sm:$0xff]  ;;  %vm181_vm6 = vcmp.ge.s32.totalorder %v336_v44, 5  ;;  %vm182_vm7 = vcmp.lt.s32.totalorder %v336_v44, 8  ;;  %v249_v61 = vadd.s32 4294967291, %v336_v44 }
  0x11   :  { %91 = vmatpush.msra.mxu1 %v83_v5  ;;  %v71_v17 = vld [vmem:[#allocation4 + $0x90] sm:$0xff]  ;;  %v70_v18 = vld [vmem:[#allocation4 + $0x88] sm:$0xff]  ;;  %v125_v19 = vld [vmem:[#allocation4 + $0x180] sm:$0xff]  ;;  %v250_v0 = vadd.s32 4294967288, %v336_v44 }
  0x12   :  { %v124_v20 = vld [vmem:[#allocation4 + $0x178] sm:$0xff]  ;;  %128 = vmatpush.msra.mxu2 %v125_v19  ;;  %v123_v21 = vld [vmem:[#allocation4 + $0x170] sm:$0xff]  ;;  %v122_v22 = vld [vmem:[#allocation4 + $0x168] sm:$0xff] }
  0x13   :  { %92 = vmatpush.msra.mxu1 %v82_v6  ;;  %v121_v23 = vld [vmem:[#allocation4 + $0x160] sm:$0xff]  ;;  %v120_v24 = vld [vmem:[#allocation4 + $0x158] sm:$0xff]  ;;  %v119_v25 = vld [vmem:[#allocation4 + $0x150] sm:$0xff] }
  0x14   :  { %129 = vmatpush.msra.mxu2 %v124_v20  ;;  %v118_v26 = vld [vmem:[#allocation4 + $0x148] sm:$0xff]  ;;  %v117_v27 = vld [vmem:[#allocation4 + $0x140] sm:$0xff]  ;;  %v116_v28 = vld [vmem:[#allocation4 + $0x138] sm:$0xff] }
  0x15   :  { %93 = vmatpush.msra.mxu1 %v81_v7  ;;  %v115_v29 = vld [vmem:[#allocation4 + $0x130] sm:$0xff]  ;;  %v41_v30 = vld [vmem:[#allocation4] sm:$0xff]  ;;  %v114_v34 = vld [vmem:[#allocation4 + $0x128] sm:$0xff] }
  0x16   :  { %130 = vmatpush.msra.mxu2 %v123_v21  ;;  %v113_v35 = vld [vmem:[#allocation4 + $0x120] sm:$0xff]  ;;  %v112_v36 = vld [vmem:[#allocation4 + $0x118] sm:$0xff]  ;;  %v111_v37 = vld [vmem:[#allocation4 + $0x110] sm:$0xff]  ;;  %v87_v39 = vrot.slane %v41_v30, 1  ;;  %v126_v45 = vrot.slane %v41_v30, 2 }
  0x17   :  { %94 = vmatpush.msra.mxu1 %v80_v8  ;;  %v110_v38 = vld [vmem:[#allocation4 + $0x108] sm:$0xff]  ;;  %vm340_vm3 = vmand %vm211_vm1, %vm212_vm2  ;;  %vm179_vm2 = vcmp.eq.s32.totalorder %v336_v44, 0 }
  0x18   :  { %131 = vmatpush.msra.mxu2 %v122_v22  ;;  %vm353_vm8 = vmand %vm181_vm6, %vm182_vm7 }
  0x19   :  { %95 = vmatpush.msra.mxu1 %v79_v9 }
  0x1a   :  { %132 = vmatpush.msra.mxu2 %v121_v23 }
  0x1b   :  { %96 = vmatpush.msra.mxu1 %v78_v10 }
  0x1c   :  { %133 = vmatpush.msra.mxu2 %v120_v24 }
  0x1d   :  { %97 = vmatpush.msra.mxu1 %v77_v11 }
  0x1e   :  { %134 = vmatpush.msra.mxu2 %v119_v25 }
  0x1f   :  { %98 = vmatpush.msra.mxu1 %v76_v12 }
  0x20   :  { %135 = vmatpush.msra.mxu2 %v118_v26 }
  0x21   :  { %99 = vmatpush.msra.mxu1 %v75_v13 }
  0x22   :  { %136 = vmatpush.msra.mxu2 %v117_v27 }
  0x23   :  { %100 = vmatpush.msra.mxu1 %v74_v14 }
  0x24   :  { %137 = vmatpush.msra.mxu2 %v116_v28 }
  0x25   :  { %101 = vmatpush.msra.mxu1 %v73_v15 }
  0x26   :  { %138 = vmatpush.msra.mxu2 %v115_v29 }
  0x27   :  { %102 = vmatpush.msra.mxu1 %v72_v16 }
  0x28   :  { %139 = vmatpush.msra.mxu2 %v114_v34 }
  0x29   :  { %103 = vmatpush.msra.mxu1 %v71_v17 }
  0x2a   :  { %140 = vmatpush.msra.mxu2 %v113_v35 }
  0x2b   :  { %104 = vmatpush.msra.mxu1 %v70_v18 }
  0x2c   :  { %141 = vmatpush.msra.mxu2 %v112_v36 }
  0x2e   :  { %142 = vmatpush.msra.mxu2 %v111_v37 }
  0x30   :  { %143 = vmatpush.msra.mxu2 %v110_v38 }
  0x8c   :  { %v66_v31 = vpop.f32.mrf.mxu0 }
  0x8d   :  { %v67_v32 = vadd.f32 %v66_v31, %v41_v30 }
  0x8f   :  { %255 = vtanh.f32 %v67_v32 }
  0x95   :  { %v256_v33 = vpop.eup %255 }
  0x96   :  { %105 = vmatmul.f32.vlgmr.msra.gmra.mxu1 %v256_v33 }
 0x113   :  { %v106_v40 = vpop.f32.mrf.mxu1 }
 0x114   :  { %v107_v41 = vadd.f32 %v106_v40, %v87_v39 }
 0x116   :  { %257 = vtanh.f32 %v107_v41 }
 0x11c   :  { %v258_v42 = vpop.eup %257 }
 0x11d   :  { %144 = vmatmul.f32.vlgmr.msra.gmra.mxu2 %v258_v42 }
 0x1a0   :  { %v145_v46 = vpop.f32.mrf.mxu2 }
 0x1a1   :  { %v146_v48 = vadd.f32 %v145_v46, %v126_v45 }
 0x1a3   :  { %v214_v49 = vsel %vm340_vm3, %v146_v48, -inf  ;;  %v153_v50 = vsel %vm151_vm4, %v146_v48, -inf  ;;  %v184_v54 = vsel %vm353_vm8, %v146_v48, -inf }
 0x1a4   :  { %v215_v51 = vsel %vm154_vm5, %v214_v49, -inf  ;;  %v155_v52 = vsel %vm154_vm5, %v153_v50, -inf  ;;  %v185_v55 = vsel %vm154_vm5, %v184_v54, -inf }
 0x1a5   :  { %216 = vmax.xlane.f32.xlu1 %v215_v51  ;;  %156 = vmax.xlane.f32.xlu0 %v155_v52 }
 0x1ad   :  { %186 = vmax.xlane.f32.xlu0 %v185_v55 }
 0x218   :  { %v157_v56 = vpop.xlane.xlu0 %156  ;;  %v217_v57 = vpop.xlane.xlu1 %216 }
 0x219   :  { %vm158_vm9 = vcmp.ge.f32.partialorder %v153_v50, %v157_v56  ;;  %vm218_vm11 = vcmp.ge.f32.partialorder %v214_v49, %v217_v57 }
 0x21a   :  { %vm159_vm10 = vmand %vm151_vm4, %vm158_vm9  ;;  %vm239_vm4 = vcmp.eq.s32.totalorder %v336_v44, 2 }
 0x21b   :  { %v160_v58 = vsel %vm159_vm10, %v336_v44, 128  ;;  %vm219_vm12 = vmand %vm340_vm3, %vm218_vm11  ;;  %vm209_vm3 = vcmp.eq.s32.totalorder %v336_v44, 1 }
 0x21c   :  { %v161_v59 = vsel %vm154_vm5, %v160_v58, 2147483647  ;;  %v221_v3 = vsel %vm219_vm12, %v250_v0, 128 }
 0x21d   :  { %v163_v60 = vshra.s32 %v161_v59, 16  ;;  %v222_v6 = vsel %vm154_vm5, %v221_v3, 2147483647  ;;  %v162_v9 = vand.u32 65535, %v161_v59 }
 0x21e   :  { %v224_v7 = vshra.s32 %v222_v6, 16  ;;  %v223_v17 = vand.u32 65535, %v222_v6 }
 0x21f   :  { %v165_v63 = vcvt.s32.f32 %v163_v60  ;;  %v164_v11 = vcvt.s32.f32 %v162_v9 }
 0x220   :  { %v187_v62 = vpop.xlane.xlu0 %186  ;;  %v226_v8 = vcvt.s32.f32 %v224_v7  ;;  %v225_v19 = vcvt.s32.f32 %v223_v17 }
 0x221   :  { %vm188_vm13 = vcmp.ge.f32.partialorder %v184_v54, %v187_v62  ;;  %166 = vmin.xlane.f32.xlu1 %v165_v63 }
 0x222   :  { %vm189_vm14 = vmand %vm353_vm8, %vm188_vm13 }
 0x223   :  { %v191_v1 = vsel %vm189_vm14, %v249_v61, 128 }
 0x224   :  { %v192_v2 = vsel %vm154_vm5, %v191_v1, 2147483647 }
 0x225   :  { %v194_v4 = vshra.s32 %v192_v2, 16  ;;  %v193_v13 = vand.u32 65535, %v192_v2 }
 0x227   :  { %v196_v5 = vcvt.s32.f32 %v194_v4  ;;  %v195_v15 = vcvt.s32.f32 %v193_v13 }
 0x229   :  { %197 = vmin.xlane.f32.xlu2 %v196_v5 }
 0x231   :  { %227 = vmin.xlane.f32.xlu2 %v226_v8 }
 0x294   :  { %v167_v10 = vpop.xlane.xlu1 %166 }
 0x295   :  { %vm168_vm15 = vcmp.eq.f32.partialorder %v165_v63, %v167_v10  ;;  %v173_v22 = vcvt.f32.s32 %v167_v10 }
 0x296   :  { %v169_v12 = vsel %vm168_vm15, %v164_v11, inf }
 0x297   :  { %170 = vmin.xlane.f32.xlu0 %v169_v12  ;;  %v174_v25 = vshll.u32 %v173_v22, 16 }
 0x29c   :  { %v198_v14 = vpop.xlane.xlu2 %197 }
 0x29d   :  { %vm199_vm0 = vcmp.eq.f32.partialorder %v196_v5, %v198_v14  ;;  %v204_v23 = vcvt.f32.s32 %v198_v14 }
 0x29e   :  { %v200_v16 = vsel %vm199_vm0, %v195_v15, inf }
 0x29f   :  { %201 = vmin.xlane.f32.xlu1 %v200_v16  ;;  %v205_v27 = vshll.u32 %v204_v23, 16 }
 0x2a4   :  { %v228_v18 = vpop.xlane.xlu2 %227 }
 0x2a5   :  { %vm229_vm1 = vcmp.eq.f32.partialorder %v226_v8, %v228_v18  ;;  %v234_v31 = vcvt.f32.s32 %v228_v18 }
 0x2a6   :  { %v230_v20 = vsel %vm229_vm1, %v225_v19, inf }
 0x2a7   :  { %231 = vmin.xlane.f32.xlu2 %v230_v20  ;;  %v235_v35 = vshll.u32 %v234_v31, 16 }
 0x30a   :  { %v171_v21 = vpop.xlane.xlu0 %170 }
 0x30b   :  { %v172_v24 = vcvt.f32.s32 %v171_v21 }
 0x30d   :  { %v175_v28 = vadd.s32 %v174_v25, %v172_v24 }
 0x30f   :  { %v176_v32 = vcvt.s32.f32 %v175_v28 }
 0x311   :  { %v177_v36 = vmul.f32 0.01, %v176_v32 }
 0x312   :  { %v202_v26 = vpop.xlane.xlu1 %201 }
 0x313   :  { %v203_v29 = vcvt.f32.s32 %v202_v26  ;;  %v180_v40 = vsel %vm179_vm2, %v177_v36, 0.0 }
 0x315   :  { %v206_v30 = vadd.s32 %v205_v27, %v203_v29 }
 0x317   :  { %v207_v33 = vcvt.s32.f32 %v206_v30 }
 0x319   :  { %v208_v38 = vadd.f32 -1.0, %v207_v33 }
 0x31a   :  { %v232_v34 = vpop.xlane.xlu2 %231 }
 0x31b   :  { %v233_v37 = vcvt.f32.s32 %v232_v34  ;;  %v210_v42 = vsel %vm209_vm3, %v208_v38, %v180_v40 }
 0x31d   :  { %v236_v39 = vadd.s32 %v235_v35, %v233_v37 }
 0x31f   :  { %v237_v41 = vcvt.s32.f32 %v236_v39 }
 0x321   :  { %v240_v43 = vsel %vm239_vm4, %v237_v41, %v210_v42 }
 0x322   :  { %241 = vst [vmem:[%s380_s2] sm:$0x1] %v240_v43 }
 0x323   :  { %246 = vsyncpa [#allocation3], 1 }
 0x324   :  { %247 = vsyncpa [#allocation5], 1 }

</bundles_post_ra>
